<compile_context>
chip_gen: v6e
topology: v6e:2x2x1
jax: 0.10.0
libtpu: 0.0.40
codegen_flags: <defaults>
</compile_context>

<pallas_src>
import functools

import jax
import jax.numpy as jnp
from jax import lax
from jax.experimental import pallas as pl
from jax.experimental.pallas import tpu as pltpu

KSIZE = 7
PAD = 3
R0 = 8          # sublane-aligned row offset of the scratch interior


def _round_up(x, m):
    return -(-x // m) * m


def _scar_attention_kernel(x_ref, w1p_ref, b1_ref, w2t_ref, b2t_ref,
                           vw_ref, rmat_ref, b7_ref, o_ref, oa_ref,
                           *, B, H, W, C, NWP):
    """One batch block per grid step.

    x_ref   : (B, H, W*C)         lane-dense input block
    w1p_ref : (W*C, Crp)          1x1 conv #1, tiled over W, pooling + BN1 folded, Cr padded to >=8
    b1_ref  : (1, Crp)
    w2t_ref : (Crp, W*C)          1x1 conv #2, tiled over W
    b2t_ref : (1, W*C)
    vw_ref  : (W*C, NWP)          7x7 conv (dw sweep + SAME clipping + BN2 folded), lane-padded to 128
    rmat_ref: (NWP, W*C)          0/1 "repeat over C" matrix, zero rows past W drop garbage lanes
    b7_ref  : (1, 1) in SMEM      folded spatial-conv bias
    o_ref   : (B, H, W*C)
    oa_ref  : (B, R0+H+PAD, NWP)  VMEM scratch for the dh-shifted combine
    """
    WC = W * C

    x = x_ref[...].astype(jnp.float32)                                 # (B, H, WC)

    # ---- channel gate: GAP -> 1x1 -> BN -> ReLU -> 1x1 -> sigmoid ----------
    rowsum = jnp.sum(x, axis=1)                                        # (B, WC)
    h = jnp.dot(rowsum, w1p_ref[...],
                preferred_element_type=jnp.float32) + b1_ref[...]      # (B, Crp)
    h = jnp.maximum(h, 0.0)
    ca_logit = jnp.dot(h, w2t_ref[...],
                       preferred_element_type=jnp.float32) + b2t_ref[...]
    # sigmoid(z) = 0.5*tanh(0.5*z)+0.5: one EUP tanh + VPU mul/add (no divide).
    ca = 0.5 * jnp.tanh(0.5 * ca_logit) + 0.5                          # (B, WC)
    x1 = x * ca[:, None, :]                                            # (B, H, WC)

    # ---- spatial gate: 7x7 conv (C -> 1), SAME padding, BN folded ----------
    x1_2d = x1.reshape(B * H, WC)
    part = jnp.dot(x1_2d.astype(vw_ref.dtype), vw_ref[...],
                   preferred_element_type=jnp.float32)                 # (B*H, NWP)

    # Zero only the 3-row halos each step (interior is fully overwritten).
    # Unconditional so the kernel stays correct when megacore shards the
    # parallel grid axis across TensorCores.
    oa_ref[:, R0 - PAD:R0, :] = jnp.zeros((B, PAD, NWP), jnp.float32)
    oa_ref[:, R0 + H:R0 + H + PAD, :] = jnp.zeros((B, PAD, NWP), jnp.float32)
    # Interior store: sublane-aligned (R0 = 8) and 128-lane-dense -> unmasked.
    oa_ref[:, R0:R0 + H, :] = part.reshape(B, H, NWP)

    # dh combine: 7 row-shifted full-width loads; lane alignment rides the XLU.
    acc = jnp.zeros((B * H, NWP), jnp.float32)
    for dh in range(KSIZE):                                            # unrolled
        slab = oa_ref[:, R0 - PAD + dh:R0 - PAD + dh + H, :].reshape(B * H, NWP)
        if dh:
            slab = pltpu.roll(slab, shift=NWP - dh * W, axis=1)
        acc = acc + slab
    # Lanes [0, W) of `acc` hold the conv result; lanes >= W hold garbage that
    # the zero rows of rmat discard below.
    sa = 0.5 * jnp.tanh(0.5 * (acc + b7_ref[0, 0])) + 0.5              # (B*H, NWP)

    # Broadcast the per-pixel gate across channels (and drop garbage lanes)
    # via a 0/1 matmul so the final multiply + store stay lane-dense.
    sa_exp = jnp.dot(sa, rmat_ref[...],
                     preferred_element_type=jnp.float32)               # (B*H, WC)

    o_ref[...] = (x1 * sa_exp.reshape(B, H, WC)).astype(o_ref.dtype)


def _build_spatial_weight(w7_hwc, W, C, nwp):
    """(7, 7, C) tap weights -> (W*C, nwp) matmul weight.

    Column dh*W + j holds, at row w'*C + c, the tap weight
    w7_hwc[dh, w'-j+PAD, c] when 0 <= w'-j+PAD < 7, else 0 (SAME-padding
    clipping folded in).  Columns >= 7*W are zero lane-padding to `nwp`.
    """
    wp = jnp.arange(W)[:, None]            # input column w'
    jj = jnp.arange(W)[None, :]            # output column j
    dw = wp - jj + PAD                     # (W, W)
    valid = (dw >= 0) & (dw < KSIZE)
    dwc = jnp.clip(dw, 0, KSIZE - 1)
    g = w7_hwc[:, dwc, :]                  # (7, W, W, C)  [dh, w', j, c]
    g = jnp.where(valid[None, :, :, None], g, 0.0)
    vw = jnp.transpose(g, (1, 3, 0, 2)).reshape(W * C, KSIZE * W)
    if nwp > KSIZE * W:
        vw = jnp.pad(vw, ((0, 0), (0, nwp - KSIZE * W)))
    return vw


def _device_kind():
    try:
        return jax.devices()[0].device_kind.lower()
    except Exception:
        return ""


def _pick_batch_block(N, H, W, C, nwp, budget_bytes, multi_tc):
    """Largest batch block that fits the VMEM data budget.

    Counts double-buffered in+out blocks, ~4 live full-size f32 intermediates
    (x cast, x1, part/acc, sa_exp) and the padded scratch tile.  Keeps >=2
    grid steps only on multi-TensorCore chips (megacore sharding); on
    single-TC v5e/v6e the largest block that fits wins.
    """
    per_img = H * W * C * 4
    rows_pad = _round_up(R0 + H + PAD, 8)
    scratch = rows_pad * nwp * 4
    denom = 8 * per_img + scratch          # 2x2 (in,out) buffers + 4 intermediates + scratch
    b = max(1, budget_bytes // denom)
    if multi_tc and N >= 2:
        b = min(b, N // 2)
    b = max(1, min(b, N))
    while N % b:
        b -= 1
    return b


def scar_attention(x, p, *, b_blk=None, vmem_budget_bytes=None,
                   use_bf16_matmul=False):
    """x: (N, H, W, C) float32, NHWC. Returns same shape/dtype."""
    N, H, W, C = x.shape
    Cr = p["w1"].shape[1]
    Crp = max(8, _round_up(Cr, 8))                     # pad reduced dim to >= 8
    WC = W * C
    NW = KSIZE * W
    NWP = max(128, _round_up(NW, 128))                 # lane-dense conv output width

    # ---- generation-aware VMEM budgeting -----------------------------------
    kind = _device_kind()
    is_v7 = ("v7" in kind) or ("7x" in kind)
    big_vmem = any(s in kind for s in ("v4", "v5", "v6"))     # 128 MiB VMEM parts
    single_tc = any(s in kind for s in ("v5e", "v5 lite", "v6e", "v6 lite"))
    if is_v7:                                   # 64 MiB physical, 2 TCs
        vmem_limit, default_budget = 40 << 20, 24 << 20
    elif big_vmem:                              # v5e/v6e/v4/v5p: 128 MiB physical
        vmem_limit, default_budget = 64 << 20, 40 << 20
    else:                                       # unknown: stay conservative
        vmem_limit, default_budget = 32 << 20, 16 << 20
    if vmem_budget_bytes is None:
        vmem_budget_bytes = default_budget

    # ---- kernel-layout weights (host-side prep; tiny) -----------------------
    inv_hw = jnp.float32(1.0 / (H * W))
    w1p = jnp.pad(jnp.tile(p["w1"], (W, 1)) * inv_hw,
                  ((0, 0), (0, Crp - Cr)))             # (W*C, Crp): pooling folded
    b1 = jnp.pad(p["b1"], ((0, 0), (0, Crp - Cr)))     # (1, Crp)
    w2t = jnp.pad(jnp.tile(p["w2"], (1, W)),
                  ((0, Crp - Cr), (0, 0)))             # (Crp, W*C): channel bcast folded
    b2t = jnp.tile(p["b2"], (1, W))                    # (1, W*C)
    vw = _build_spatial_weight(p["w7_hwc"], W, C, NWP)  # (W*C, NWP)
    if use_bf16_matmul:
        vw = vw.astype(jnp.bfloat16)                   # TODO(synk): loosens tolerance
    rmat = jnp.kron(jnp.eye(W, dtype=jnp.float32),
                    jnp.ones((1, C), jnp.float32))     # (W, W*C)
    rmat = jnp.pad(rmat, ((0, NWP - W), (0, 0)))       # (NWP, W*C): zero rows kill pad lanes

    if b_blk is None:
        b_blk = _pick_batch_block(N, H, W, C, NWP, vmem_budget_bytes,
                                  multi_tc=not single_tc)
    grid_n = N // b_blk

    x2 = x.reshape(N, H, WC)                           # free HBM reshape -> lane-dense blocks

    kernel = functools.partial(_scar_attention_kernel,
                               B=b_blk, H=H, W=W, C=C, NWP=NWP)
    out = pl.pallas_call(
        kernel,
        out_shape=jax.ShapeDtypeStruct((N, H, WC), x.dtype),
        grid_spec=pltpu.PrefetchScalarGridSpec(
            num_scalar_prefetch=0,
            grid=(grid_n,),
            in_specs=[
                pl.BlockSpec((b_blk, H, WC), lambda n: (n, 0, 0)),
                pl.BlockSpec((WC, Crp), lambda n: (0, 0)),
                pl.BlockSpec((1, Crp), lambda n: (0, 0)),
                pl.BlockSpec((Crp, WC), lambda n: (0, 0)),
                pl.BlockSpec((1, WC), lambda n: (0, 0)),
                pl.BlockSpec((WC, NWP), lambda n: (0, 0)),
                pl.BlockSpec((NWP, WC), lambda n: (0, 0)),
                pl.BlockSpec(memory_space=pltpu.MemorySpace.SMEM),   # b7 scalar
            ],
            out_specs=pl.BlockSpec((b_blk, H, WC), lambda n: (n, 0, 0)),
            scratch_shapes=[pltpu.VMEM((b_blk, R0 + H + PAD, NWP), jnp.float32)],
        ),
        compiler_params=pltpu.CompilerParams(
            dimension_semantics=("parallel",),
            vmem_limit_bytes=vmem_limit,
        ),
    )(x2, w1p, b1, w2t, b2t, vw, rmat, p["b7"])
    return out.reshape(N, H, W, C)


def init_params(key, C):
    """Deterministic parameter init matching ScarAttention(in_channels=C).

    BatchNorms are folded with eval-mode (running-stat) semantics.
    """
    Cr = max(C // 8, 1)
    eps = 1e-5
    ks = jax.random.split(key, 8)
    W1 = 0.2 * jax.random.normal(ks[0], (Cr, C, 1, 1), jnp.float32)   # Conv2d(C, C//8, 1)
    b1 = 0.1 * jax.random.normal(ks[1], (Cr,), jnp.float32)
    g1 = 1.0 + 0.1 * jax.random.normal(ks[2], (Cr,), jnp.float32)     # BatchNorm2d(C//8)
    be1 = 0.1 * jax.random.normal(ks[3], (Cr,), jnp.float32)
    rm1 = 0.05 * jax.random.normal(ks[4], (Cr,), jnp.float32)
    rv1 = 1.0 + 0.1 * jnp.abs(jax.random.normal(ks[5], (Cr,), jnp.float32))
    W2 = 0.2 * jax.random.normal(ks[6], (C, Cr, 1, 1), jnp.float32)   # Conv2d(C//8, C, 1)
    b2 = 0.1 * jax.random.normal(ks[7], (C,), jnp.float32)

    ks2 = jax.random.split(jax.random.fold_in(key, 1), 6)
    W7 = 0.05 * jax.random.normal(ks2[0], (1, C, KSIZE, KSIZE), jnp.float32)  # Conv2d(C, 1, 7, pad=3)
    b7 = 0.1 * jax.random.normal(ks2[1], (1,), jnp.float32)
    g2 = 1.0 + 0.1 * jax.random.normal(ks2[2], (1,), jnp.float32)     # BatchNorm2d(1)
    be2 = 0.1 * jax.random.normal(ks2[3], (1,), jnp.float32)
    rm2 = 0.05 * jax.random.normal(ks2[4], (1,), jnp.float32)
    rv2 = 1.0 + 0.1 * jnp.abs(jax.random.normal(ks2[5], (1,), jnp.float32))

    # Fold BN1 into conv1 (acts on (1,1)-spatial pooled features -> pure matmul).
    k1 = g1 / jnp.sqrt(rv1 + eps)
    w1_mat = W1[:, :, 0, 0].T * k1[None, :]                 # (C, Cr)
    b1_vec = ((b1 - rm1) * k1 + be1).reshape(1, Cr)
    w2_mat = W2[:, :, 0, 0].T                               # (Cr, C)
    b2_vec = b2.reshape(1, C)

    # Fold BN2 into the 7x7 conv (single output channel).
    k2 = g2 / jnp.sqrt(rv2 + eps)                           # (1,)
    w7_hwc = jnp.transpose(W7[0], (1, 2, 0)) * k2           # (7, 7, C), scaled
    b7_fold = ((b7 - rm2) * k2 + be2).reshape(1, 1)

    return dict(w1=w1_mat, b1=b1_vec, w2=w2_mat, b2=b2_vec,
                w7_hwc=w7_hwc, b7=b7_fold)


def reference(x, p):
    """Pure-JAX reference (NHWC) with the same folded parameters."""
    pooled = jnp.mean(x, axis=(1, 2))                               # (N, C)
    h = jnp.maximum(pooled @ p["w1"] + p["b1"], 0.0)                # (N, Cr)
    ca = jax.nn.sigmoid(h @ p["w2"] + p["b2"])                      # (N, C)
    x1 = x * ca[:, None, None, :]
    conv = lax.conv_general_dilated(
        x1, p["w7_hwc"][..., None], window_strides=(1, 1), padding="SAME",
        dimension_numbers=("NHWC", "HWIO", "NHWC"))                 # (N, H, W, 1)
    sa = jax.nn.sigmoid(conv + p["b7"][0, 0])
    return x1 * sa


if __name__ == "__main__":
    key = jax.random.PRNGKey(0)
    kx, kp = jax.random.split(key)

    N, C, H, W = 2, 16, 16, 16          # in_channels=16 so in_channels//8 = 2
    x = jax.random.normal(kx, (N, H, W, C), jnp.float32)   # NHWC (== NCHW [2,16,16,16] transposed)
    params = init_params(kp, C)

    out = jax.block_until_ready(scar_attention(x, params))
    ref = jax.block_until_ready(reference(x, params))

    assert out.shape == (N, H, W, C) and out.dtype == jnp.float32
    if not bool(jnp.allclose(out, ref, atol=2e-4, rtol=2e-4)):
        max_err = float(jnp.max(jnp.abs(out - ref)))
        raise AssertionError(f"Pallas kernel mismatch vs reference, max_err={max_err}")

    print("KERNEL_OK")
</pallas_src>

<mosaic_0001>
module attributes {stable_mosaic.version = 11 : i64} {
  func.func @_scar_attention_kernel(%arg0: i32, %arg1: memref<1x16x256xf32, #tpu.memory_space<vmem>>, %arg2: memref<256x8xf32, #tpu.memory_space<vmem>>, %arg3: memref<1x8xf32, #tpu.memory_space<vmem>>, %arg4: memref<8x256xf32, #tpu.memory_space<vmem>>, %arg5: memref<1x256xf32, #tpu.memory_space<vmem>>, %arg6: memref<256x128xf32, #tpu.memory_space<vmem>>, %arg7: memref<128x256xf32, #tpu.memory_space<vmem>>, %arg8: memref<1x1xf32, #tpu.memory_space<smem>>, %arg9: memref<1x16x256xf32, #tpu.memory_space<vmem>>, %arg10: memref<1x27x128xf32, #tpu.memory_space<vmem>>) attributes {dimension_semantics = [#tpu.dimension_semantics<parallel>], iteration_bounds = array<i64: 2>, scalar_prefetch = 0 : i64, scratch_operands = 1 : i64, tpu.core_type = #tpu.core_type<tc>, window_params = [{transform_indices = @transform_0, window_bounds = array<i64: 1, 16, 256>}, {pipeline_mode = #tpu.pipeline_mode<synchronous>, transform_indices = @transform_1, window_bounds = array<i64: 256, 8>}, {pipeline_mode = #tpu.pipeline_mode<synchronous>, transform_indices = @transform_2, window_bounds = array<i64: 1, 8>}, {pipeline_mode = #tpu.pipeline_mode<synchronous>, transform_indices = @transform_3, window_bounds = array<i64: 8, 256>}, {pipeline_mode = #tpu.pipeline_mode<synchronous>, transform_indices = @transform_4, window_bounds = array<i64: 1, 256>}, {pipeline_mode = #tpu.pipeline_mode<synchronous>, transform_indices = @transform_5, window_bounds = array<i64: 256, 128>}, {pipeline_mode = #tpu.pipeline_mode<synchronous>, transform_indices = @transform_6, window_bounds = array<i64: 128, 256>}, {transform_indices = @transform_7, window_bounds = array<i64: 1, 1>}, {transform_indices = @transform_8, window_bounds = array<i64: 1, 16, 256>}]} {
    %c0 = arith.constant 0 : index
    %c0_0 = arith.constant 0 : index
    %c0_1 = arith.constant 0 : index
    %0 = vector.load %arg1[%c0, %c0_0, %c0_1] : memref<1x16x256xf32, #tpu.memory_space<vmem>>, vector<1x16x256xf32>
    %cst = arith.constant dense<0.000000e+00> : vector<1x256xf32>
    %1 = vector.multi_reduction <add>, %0, %cst [1] : vector<1x16x256xf32> to vector<1x256xf32>
    %c0_2 = arith.constant 0 : index
    %c0_3 = arith.constant 0 : index
    %2 = vector.load %arg2[%c0_2, %c0_3] : memref<256x8xf32, #tpu.memory_space<vmem>>, vector<256x8xf32>
    %cst_4 = arith.constant dense<0.000000e+00> : vector<1x8xf32>
    %3 = tpu.matmul %1, %2, %cst_4 {dimension_numbers = #tpu.dot_dimension_numbers<[1], [0], [0], [1], [0, 0, 1, 1], [], []>} : vector<1x256xf32>, vector<256x8xf32>, vector<1x8xf32> -> vector<1x8xf32>
    %c0_5 = arith.constant 0 : index
    %c0_6 = arith.constant 0 : index
    %4 = vector.load %arg3[%c0_5, %c0_6] : memref<1x8xf32, #tpu.memory_space<vmem>>, vector<1x8xf32>
    %5 = arith.addf %3, %4 : vector<1x8xf32>
    %cst_7 = arith.constant 0.000000e+00 : f32
    %6 = vector.broadcast %cst_7 : f32 to vector<1x8xf32>
    %7 = arith.maximumf %5, %6 : vector<1x8xf32>
    %c0_8 = arith.constant 0 : index
    %c0_9 = arith.constant 0 : index
    %8 = vector.load %arg4[%c0_8, %c0_9] : memref<8x256xf32, #tpu.memory_space<vmem>>, vector<8x256xf32>
    %cst_10 = arith.constant dense<0.000000e+00> : vector<1x256xf32>
    %9 = tpu.matmul %7, %8, %cst_10 {dimension_numbers = #tpu.dot_dimension_numbers<[1], [0], [0], [1], [0, 0, 1, 1], [], []>} : vector<1x8xf32>, vector<8x256xf32>, vector<1x256xf32> -> vector<1x256xf32>
    %c0_11 = arith.constant 0 : index
    %c0_12 = arith.constant 0 : index
    %10 = vector.load %arg5[%c0_11, %c0_12] : memref<1x256xf32, #tpu.memory_space<vmem>>, vector<1x256xf32>
    %11 = arith.addf %9, %10 : vector<1x256xf32>
    %cst_13 = arith.constant 5.000000e-01 : f32
    %12 = vector.broadcast %cst_13 : f32 to vector<1x256xf32>
    %13 = arith.mulf %12, %11 : vector<1x256xf32>
    %14 = math.tanh %13 : vector<1x256xf32>
    %cst_14 = arith.constant 5.000000e-01 : f32
    %15 = vector.broadcast %cst_14 : f32 to vector<1x256xf32>
    %16 = arith.mulf %15, %14 : vector<1x256xf32>
    %cst_15 = arith.constant 5.000000e-01 : f32
    %17 = vector.broadcast %cst_15 : f32 to vector<1x256xf32>
    %18 = arith.addf %16, %17 : vector<1x256xf32>
    %19 = vector.shape_cast %18 : vector<1x256xf32> to vector<1x1x256xf32>
    %20 = vector.broadcast %19 : vector<1x1x256xf32> to vector<1x16x256xf32>
    %21 = arith.mulf %0, %20 : vector<1x16x256xf32>
    %22 = vector.shape_cast %21 : vector<1x16x256xf32> to vector<16x256xf32>
    %c0_16 = arith.constant 0 : index
    %c0_17 = arith.constant 0 : index
    %23 = vector.load %arg6[%c0_16, %c0_17] : memref<256x128xf32, #tpu.memory_space<vmem>>, vector<256x128xf32>
    %cst_18 = arith.constant dense<0.000000e+00> : vector<16x128xf32>
    %24 = tpu.matmul %22, %23, %cst_18 {dimension_numbers = #tpu.dot_dimension_numbers<[1], [0], [0], [1], [0, 0, 1, 1], [], []>} : vector<16x256xf32>, vector<256x128xf32>, vector<16x128xf32> -> vector<16x128xf32>
    %cst_19 = arith.constant 0.000000e+00 : f32
    %25 = vector.broadcast %cst_19 : f32 to vector<1x3x128xf32>
    %c0_20 = arith.constant 0 : index
    %c5 = arith.constant 5 : index
    %c0_21 = arith.constant 0 : index
    %26 = vector.load %arg10[%c0_20, %c5, %c0_21] : memref<1x27x128xf32, #tpu.memory_space<vmem>>, vector<1x3x128xf32>
    tpu.vector_store %arg10[%c0_20, %c5, %c0_21], %25 {strides = array<i32>} : memref<1x27x128xf32, #tpu.memory_space<vmem>>, vector<1x3x128xf32>,
    %cst_22 = arith.constant 0.000000e+00 : f32
    %27 = vector.broadcast %cst_22 : f32 to vector<1x3x128xf32>
    %c0_23 = arith.constant 0 : index
    %c24 = arith.constant 24 : index
    %c0_24 = arith.constant 0 : index
    %28 = vector.load %arg10[%c0_23, %c24, %c0_24] : memref<1x27x128xf32, #tpu.memory_space<vmem>>, vector<1x3x128xf32>
    tpu.vector_store %arg10[%c0_23, %c24, %c0_24], %27 {strides = array<i32>} : memref<1x27x128xf32, #tpu.memory_space<vmem>>, vector<1x3x128xf32>,
    %29 = vector.shape_cast %24 : vector<16x128xf32> to vector<1x16x128xf32>
    %c0_25 = arith.constant 0 : index
    %c8 = arith.constant 8 : index
    %c0_26 = arith.constant 0 : index
    %30 = vector.load %arg10[%c0_25, %c8, %c0_26] : memref<1x27x128xf32, #tpu.memory_space<vmem>>, vector<1x16x128xf32>
    tpu.vector_store %arg10[%c0_25, %c8, %c0_26], %29 {strides = array<i32>} : memref<1x27x128xf32, #tpu.memory_space<vmem>>, vector<1x16x128xf32>,
    %cst_27 = arith.constant 0.000000e+00 : f32
    %31 = vector.broadcast %cst_27 : f32 to vector<16x128xf32>
    %c0_28 = arith.constant 0 : index
    %c5_29 = arith.constant 5 : index
    %c0_30 = arith.constant 0 : index
    %32 = vector.load %arg10[%c0_28, %c5_29, %c0_30] : memref<1x27x128xf32, #tpu.memory_space<vmem>>, vector<1x16x128xf32>
    %33 = vector.shape_cast %32 : vector<1x16x128xf32> to vector<16x128xf32>
    %34 = arith.addf %31, %33 : vector<16x128xf32>
    %c0_31 = arith.constant 0 : index
    %c6 = arith.constant 6 : index
    %c0_32 = arith.constant 0 : index
    %35 = vector.load %arg10[%c0_31, %c6, %c0_32] : memref<1x27x128xf32, #tpu.memory_space<vmem>>, vector<1x16x128xf32>
    %36 = vector.shape_cast %35 : vector<1x16x128xf32> to vector<16x128xf32>
    %c112_i32 = arith.constant 112 : i32
    %37 = tpu.dynamic_rotate %36 by %c112_i32 dim 1 : vector<16x128xf32>, i32 -> vector<16x128xf32>
    %38 = arith.addf %34, %37 : vector<16x128xf32>
    %c0_33 = arith.constant 0 : index
    %c7 = arith.constant 7 : index
    %c0_34 = arith.constant 0 : index
    %39 = vector.load %arg10[%c0_33, %c7, %c0_34] : memref<1x27x128xf32, #tpu.memory_space<vmem>>, vector<1x16x128xf32>
    %40 = vector.shape_cast %39 : vector<1x16x128xf32> to vector<16x128xf32>
    %c96_i32 = arith.constant 96 : i32
    %41 = tpu.dynamic_rotate %40 by %c96_i32 dim 1 : vector<16x128xf32>, i32 -> vector<16x128xf32>
    %42 = arith.addf %38, %41 : vector<16x128xf32>
    %c0_35 = arith.constant 0 : index
    %c8_36 = arith.constant 8 : index
    %c0_37 = arith.constant 0 : index
    %43 = vector.load %arg10[%c0_35, %c8_36, %c0_37] : memref<1x27x128xf32, #tpu.memory_space<vmem>>, vector<1x16x128xf32>
    %44 = vector.shape_cast %43 : vector<1x16x128xf32> to vector<16x128xf32>
    %c80_i32 = arith.constant 80 : i32
    %45 = tpu.dynamic_rotate %44 by %c80_i32 dim 1 : vector<16x128xf32>, i32 -> vector<16x128xf32>
    %46 = arith.addf %42, %45 : vector<16x128xf32>
    %c0_38 = arith.constant 0 : index
    %c9 = arith.constant 9 : index
    %c0_39 = arith.constant 0 : index
    %47 = vector.load %arg10[%c0_38, %c9, %c0_39] : memref<1x27x128xf32, #tpu.memory_space<vmem>>, vector<1x16x128xf32>
    %48 = vector.shape_cast %47 : vector<1x16x128xf32> to vector<16x128xf32>
    %c64_i32 = arith.constant 64 : i32
    %49 = tpu.dynamic_rotate %48 by %c64_i32 dim 1 : vector<16x128xf32>, i32 -> vector<16x128xf32>
    %50 = arith.addf %46, %49 : vector<16x128xf32>
    %c0_40 = arith.constant 0 : index
    %c10 = arith.constant 10 : index
    %c0_41 = arith.constant 0 : index
    %51 = vector.load %arg10[%c0_40, %c10, %c0_41] : memref<1x27x128xf32, #tpu.memory_space<vmem>>, vector<1x16x128xf32>
    %52 = vector.shape_cast %51 : vector<1x16x128xf32> to vector<16x128xf32>
    %c48_i32 = arith.constant 48 : i32
    %53 = tpu.dynamic_rotate %52 by %c48_i32 dim 1 : vector<16x128xf32>, i32 -> vector<16x128xf32>
    %54 = arith.addf %50, %53 : vector<16x128xf32>
    %c0_42 = arith.constant 0 : index
    %c11 = arith.constant 11 : index
    %c0_43 = arith.constant 0 : index
    %55 = vector.load %arg10[%c0_42, %c11, %c0_43] : memref<1x27x128xf32, #tpu.memory_space<vmem>>, vector<1x16x128xf32>
    %56 = vector.shape_cast %55 : vector<1x16x128xf32> to vector<16x128xf32>
    %c32_i32 = arith.constant 32 : i32
    %57 = tpu.dynamic_rotate %56 by %c32_i32 dim 1 : vector<16x128xf32>, i32 -> vector<16x128xf32>
    %58 = arith.addf %54, %57 : vector<16x128xf32>
    %c0_44 = arith.constant 0 : index
    %c0_45 = arith.constant 0 : index
    %59 = memref.load %arg8[%c0_44, %c0_45] : memref<1x1xf32, #tpu.memory_space<smem>>
    %60 = vector.broadcast %59 : f32 to vector<16x128xf32>
    %61 = arith.addf %58, %60 : vector<16x128xf32>
    %cst_46 = arith.constant 5.000000e-01 : f32
    %62 = vector.broadcast %cst_46 : f32 to vector<16x128xf32>
    %63 = arith.mulf %62, %61 : vector<16x128xf32>
    %64 = math.tanh %63 : vector<16x128xf32>
    %cst_47 = arith.constant 5.000000e-01 : f32
    %65 = vector.broadcast %cst_47 : f32 to vector<16x128xf32>
    %66 = arith.mulf %65, %64 : vector<16x128xf32>
    %cst_48 = arith.constant 5.000000e-01 : f32
    %67 = vector.broadcast %cst_48 : f32 to vector<16x128xf32>
    %68 = arith.addf %66, %67 : vector<16x128xf32>
    %c0_49 = arith.constant 0 : index
    %c0_50 = arith.constant 0 : index
    %69 = vector.load %arg7[%c0_49, %c0_50] : memref<128x256xf32, #tpu.memory_space<vmem>>, vector<128x256xf32>
    %cst_51 = arith.constant dense<0.000000e+00> : vector<16x256xf32>
    %70 = tpu.matmul %68, %69, %cst_51 {dimension_numbers = #tpu.dot_dimension_numbers<[1], [0], [0], [1], [0, 0, 1, 1], [], []>} : vector<16x128xf32>, vector<128x256xf32>, vector<16x256xf32> -> vector<16x256xf32>
    %71 = vector.shape_cast %70 : vector<16x256xf32> to vector<1x16x256xf32>
    %72 = arith.mulf %21, %71 : vector<1x16x256xf32>
    %c0_52 = arith.constant 0 : index
    %c0_53 = arith.constant 0 : index
    %c0_54 = arith.constant 0 : index
    %73 = vector.load %arg9[%c0_52, %c0_53, %c0_54] : memref<1x16x256xf32, #tpu.memory_space<vmem>>, vector<1x16x256xf32>
    tpu.vector_store %arg9[%c0_52, %c0_53, %c0_54], %72 {strides = array<i32>} : memref<1x16x256xf32, #tpu.memory_space<vmem>>, vector<1x16x256xf32>,
    return
  }
  func.func @transform_0(%arg0: i32) -> (i32, i32, i32) {
    %c0_i32 = arith.constant 0 : i32
    %c0_i32_0 = arith.constant 0 : i32
    %c0_i32_1 = arith.constant 0 : i32
    return %arg0, %c0_i32, %c0_i32_0 : i32, i32, i32
  }
  func.func @transform_1(%arg0: i32) -> (i32, i32) {
    %c0_i32 = arith.constant 0 : i32
    %c0_i32_0 = arith.constant 0 : i32
    %c0_i32_1 = arith.constant 0 : i32
    return %c0_i32, %c0_i32_0 : i32, i32
  }
  func.func @transform_2(%arg0: i32) -> (i32, i32) {
    %c0_i32 = arith.constant 0 : i32
    %c0_i32_0 = arith.constant 0 : i32
    %c0_i32_1 = arith.constant 0 : i32
    return %c0_i32, %c0_i32_0 : i32, i32
  }
  func.func @transform_3(%arg0: i32) -> (i32, i32) {
    %c0_i32 = arith.constant 0 : i32
    %c0_i32_0 = arith.constant 0 : i32
    %c0_i32_1 = arith.constant 0 : i32
    return %c0_i32, %c0_i32_0 : i32, i32
  }
  func.func @transform_4(%arg0: i32) -> (i32, i32) {
    %c0_i32 = arith.constant 0 : i32
    %c0_i32_0 = arith.constant 0 : i32
    %c0_i32_1 = arith.constant 0 : i32
    return %c0_i32, %c0_i32_0 : i32, i32
  }
  func.func @transform_5(%arg0: i32) -> (i32, i32) {
    %c0_i32 = arith.constant 0 : i32
    %c0_i32_0 = arith.constant 0 : i32
    %c0_i32_1 = arith.constant 0 : i32
    return %c0_i32, %c0_i32_0 : i32, i32
  }
  func.func @transform_6(%arg0: i32) -> (i32, i32) {
    %c0_i32 = arith.constant 0 : i32
    %c0_i32_0 = arith.constant 0 : i32
    %c0_i32_1 = arith.constant 0 : i32
    return %c0_i32, %c0_i32_0 : i32, i32
  }
  func.func @transform_7(%arg0: i32) -> (i32, i32) {
    %c0_i32 = arith.constant 0 : i32
    %c0_i32_0 = arith.constant 0 : i32
    %c0_i32_1 = arith.constant 0 : i32
    return %c0_i32, %c0_i32_0 : i32, i32
  }
  func.func @transform_8(%arg0: i32) -> (i32, i32, i32) {
    %c0_i32 = arith.constant 0 : i32
    %c0_i32_0 = arith.constant 0 : i32
    %c0_i32_1 = arith.constant 0 : i32
    return %arg0, %c0_i32, %c0_i32_0 : i32, i32, i32
  }
}

</mosaic_0001>

<bundles_post_ra>
// kernel: tpu_custom_call.1
= control target key start
LH: loop header
LB: loop body
LE: loop exit
PB: predicated region body
PF: predicated region fallthrough
CT: control target
= control target key end

     0   :  { %s1780_s0 = inlined_call_operand.hbm [shape: f32[2,16,256], index: 0, kind: input, shape index: {}]   ;;  %s1781_s1 = inlined_call_operand.vmem [shape: f32[256,8], index: 1, kind: input, shape index: {}]   ;;  %s1782_s2 = inlined_call_operand.vmem [shape: f32[1,8], index: 2, kind: input, shape index: {}]   ;;  %s1783_s3 = inlined_call_operand.vmem [shape: f32[8,256], index: 3, kind: input, shape index: {}]   ;;  %s1784_s4 = inlined_call_operand.vmem [shape: f32[1,256], index: 4, kind: input, shape index: {}]   ;;  %s1785_s5 = inlined_call_operand.vmem [shape: f32[256,128], index: 5, kind: input, shape index: {}]   ;;  %s1786_s6 = inlined_call_operand.hbm [shape: f32[128,256], index: 6, kind: input, shape index: {}]   ;;  %s1787_s7 = inlined_call_operand.<no memory space> [shape: f32[1,1], index: 7, kind: input, shape index: {}]   ;;  %s1788_s8 = inlined_call_operand.hbm [shape: f32[2,16,256], index: 8, kind: output, shape index: {}]  }
   0x1   :  { %1795 = sst [smem:[#allocation13_spill]] %s1786_s6 }
   0x2   :  { %13 = sst [smem:[#allocation3]] %s1787_s7 }
   0x3   :  { %14 = vsyncpa [#allocation5], 0 }
   0x4   :  { %16 = vsyncpa [#allocation5 + $0x1], 0 }
   0x5   :  { %17 = vsyncpa [#allocation8], 0 }
   0x6   :  { %18 = vsyncpa [#allocation6], 0 }
   0x7   :  { %20 = vsyncpa [#allocation6 + $0x1], 0  ;;  %s1346_s29 = smov 0   ;;  %s1348_s30 = smov 0  }
   0x8   :  { %s1350_s9 = smov 0   ;;  %s1352_s10 = smov 0  }
   0x9 LB: > { %s1367_s7 = sadd.s32 4294967295, %s1282_s10   ;;  %s960_s11 = sadd.s32 4294967294, %s1282_s10   ;;  %s1282_s10 = sphi %s1352_s10, %s1816_s10   ;;  %s1278_s9 = sphi %s1350_s9, %s1815_s9   ;;  %s1274_s30 = sphi %s1348_s30, %s1814_s30   ;;  %s1270_s29 = sphi %s1346_s29, %s1813_s29  }
   0xa   : > { %p46_p0 = scmp.ne.s32.totalorder %s1274_s30, %s1270_s29  ;;  %p1790_p1 = scmp.eq.s32.totalorder %s1367_s7, 0 }
   0xb   : > { %p223_p3 = scmp.eq.s32.totalorder %s960_s11, 1  ;;  %p961_p5 = scmp.ge.s32.totalorder %s1282_s10, 1 }
   0xc   : > { %p1376_p4 = por %p1790_p1, %p46_p0  ;;  %p230_p7 = scmp.lt.s32.totalorder %s1282_s10, 3 }
   0xd   : > { %p1381_p6 = por %p223_p3, %p46_p0  ;;  %s1284_s15 = smov [#allocation7]  }
   0xe   : > { %s1796_s12 = scalar_select %p1376_p4, 1, 0 }
   0xf   : > { %s1797_s13 = scalar_select %p1381_p6, 1, 0 }
  0x10   : > { %p1386_p8 = pnand %p961_p5, %p230_p7  ;;  %s257_s16 = sshll.u32 %s1284_s15, 4  ;;  %s258_s16 = int_to_ptr.vmem [resolvable:$true] %s257_s16 }
  0x11   : > { %s1400_s18 = sadd.s32 1, %s1282_s10   ;;  %s33_s19 = sadd.s32 1, %s1278_s9 }
  0x12   : > { %s1798_s14 = scalar_select %p1386_p8, 1, 0 }
  0x13   : > { %p1092_p9 = pneg %p1386_p8  ;;  %s30_s20 = ssub.s32 %s1282_s10, %s1400_s18 }
  0x14   : > { %s1171_s21 = scalar_lea.vmem %s258_s16, 4096  ;;  %p1179_p5 = scmp.lt.s32.totalorder %s258_s16, %s258_s16 }
  0x15   : > { %p1395_p11 = pnand %p1092_p9, %p1790_p1  ;;  %p1172_p13 = scmp.ne.s32.totalorder %s258_s16, %s1171_s21 }
  0x16   : > { %p1180_p7 = scmp.lt.s32.totalorder %s1171_s21, %s1171_s21 }
  0x17   : > { %p1162_p12 = pneg %p1395_p11 }
  0x18   : > { %p1181_p10 = por %p1180_p7, %p1179_p5 }
  0x19   : > { %p1174_p0 = pnand %p1172_p13, %p1162_p12 }
  0x1b   : > { %p1175_p3 = pneg %p1174_p0 }
  0x1d   : > { %p1182_p2 = pnand %p1181_p10, %p1175_p3 }
  0x1f   : > { %1185 = shalt.err (!%p1182_p2)
}
  0x20   : > { %s1789_s22 = smov 256   ;;  %s1791_s23 = smov 16  }
  0x21   : > { %s1800_s6 = sld [smem:[#allocation13_spill]]  ;;  %p31_p2 = scmp.eq.s32.totalorder %s30_s20, 0 }
  0x22   : > { %p40_p9 = scmp.ne.s32.totalorder %s1278_s9, %s1274_s30  ;;  %p41_p10 = scmp.eq.s32.totalorder %s1282_s10, 0 }
  0x23   : > { %p1105_p12 = scmp.lt.s32.totalorder %s1282_s10, 2  ;;  %p1801_p0 = scmp.eq.s32.totalorder %s1367_s7, 1 }
  0x24   : > { %s1420_s26 = scalar_select %p31_p2, %s1278_s9, %s33_s19  }
  0x25   : > { %p42_p13 = por %p41_p10, %p40_p9  ;;  %p1424_p3 = por %p1801_p0, %p40_p9 }
  0x26   : > { %s274_s28 = sand.u32 1, %s1278_s9   ;;  %s977_s11 = sshll.u32 %s1282_s10, 9 }
  0x27   : > { %1095 = dma.hbm_to_vmem [thread:$0]  (!%p1395_p11), %s1800_s6, 4096, %s258_s16, [#allocation8], %s1789_s22, %s1789_s22, %s1791_s23  }
  0x28   : > { %s1802_s27 = scalar_select %p1424_p3, 1, 0 }
  0x29   : > { %s964_s15 = sshll.u32 %s274_s28, 5  ;;  %s1433_s24 = scalar_lea.hbm %s1780_s0, %s977_s11 }
  0x2a   : > { %s278_s16 = scalar_lea.vmem [#allocation4], %s964_s15  ;;  %p1435_p11 = pnand %p1105_p12, %p42_p13 }
  0x2b   : > { %s285_s19 = sshll.u32 %s278_s16, 4  ;;  %s1441_s25 = scalar_lea.sflag [#allocation5], %s274_s28  ;;  %s1439_s19 = int_to_ptr.vmem [resolvable:$true] %s285_s19 }
  0x2c   : > { %s1186_s22 = scalar_lea.hbm %s1433_s24, 512  ;;  %p1188_p7 = pneg %p1435_p11 }
  0x2d   : > { %p1187_p5 = scmp.ne.s32.totalorder %s1433_s24, %s1186_s22  ;;  %s1191_s15 = scalar_lea.hbm %s1780_s0, 1024 }
  0x2e   : > { %p1192_p10 = scmp.lt.s32.totalorder %s1433_s24, %s1780_s0  ;;  %p1193_p12 = scmp.lt.s32.totalorder %s1191_s15, %s1186_s22 }
  0x2f   : > { %p1189_p2 = pnand %p1188_p7, %p1187_p5 }
  0x30   : > { %p1194_p13 = por %p1193_p12, %p1192_p10 }
  0x31   : > { %p1190_p9 = pneg %p1189_p2 }
  0x33   : > { %p1195_p0 = pnand %p1194_p13, %p1190_p9 }
  0x35   : > { %1198 = shalt.err (!%p1195_p0)
}
  0x36   : > { %s1199_s28 = scalar_lea.vmem %s1439_s19, 512  ;;  %s1287_s23 = smov [#allocation4]  }
  0x37   : > { %p1200_p1 = scmp.ne.s32.totalorder %s1439_s19, %s1199_s28  ;;  %s1204_s6 = sshll.u32 %s1287_s23, 4  ;;  %s1205_s6 = int_to_ptr.vmem [resolvable:$false] %s1204_s6 }
  0x38   : > { %s1206_s11 = scalar_lea.vmem %s1205_s6, 1024  ;;  %p1207_p2 = scmp.lt.s32.totalorder %s1439_s19, %s1205_s6 }
  0x39   : > { %p1202_p6 = pnand %p1200_p1, %p1188_p7  ;;  %p1208_p3 = scmp.lt.s32.totalorder %s1206_s11, %s1199_s28 }
  0x3b   : > { %p1203_p5 = pneg %p1202_p6  ;;  %p1209_p4 = por %p1208_p3, %p1207_p2 }
  0x3d   : > { %p1210_p8 = pnand %p1209_p4, %p1203_p5 }
  0x3f   : > { %1213 = shalt.err (!%p1210_p8)
}
  0x40   : > { %s1804_s22 = smov 16   ;;  %s1805_s17 = smov 256  }
  0x41   : > { %1099 = dma.hbm_to_vmem [thread:$0]  (!%p1435_p11), %s1433_s24, 512, %s1439_s19, %s1441_s25, %s1805_s17, %s1805_s17, %s1804_s22  }
  0x42   : > { %p1806_p1 = scmp.ne.s32.totalorder %s1798_s14, 0 }
  0x43   : > { %s1468_s23 = sand.u32 (!%p1806_p1), 1, %s1274_s30   ;;  %p1807_p4 = scmp.ne.s32.totalorder (!%p1806_p1), %s1796_s12, 0 }
  0x44   : > { %297 = sbr.rel (%p1806_p1) target bundleno = 1109 (0x455), region = 52  ;;  %s968_s6 = sshll.u32 (!%p1806_p1), %s1468_s23, 5 }
  0x45   : > { %s300_s15 = scalar_lea.sflag (!%p1806_p1), [#allocation5], %s1468_s23  ;;  %s1474_s20 = scalar_lea.vmem (!%p1806_p1), [#allocation4], %s968_s6 }
  0x49   : > { %1257 = dma.done.wait (%p1807_p4), %s300_s15, 512  }
  0x4a   : > { %1259 = vsyncadd (%p1807_p4), %s300_s15, 4294966784  ;;  %p1808_p6 = scmp.eq.s32.totalorder %s1367_s7, 0 }
  0x4c   : > { %1261 = dma.done.wait (%p1808_p6), [#allocation8], 4096   ;;  %p1809_p8 = pmov %p1808_p6 }
  0x4d   : > { %v389_v0 = vld [vmem:[%s1781_s1 + $0xf8] sm:$0xff]  ;;  %v388_v2 = vld [vmem:[%s1781_s1 + $0xf0] sm:$0xff]  ;;  %v387_v4 = vld [vmem:[%s1781_s1 + $0xe8] sm:$0xff]  ;;  %v1288_v52 = vmov 0.0   ;;  %vm476_vm0 = vcmask 64512   ;;  %s1289_s11 = smov 96  }
  0x4e   : > { %1263 = vsyncadd (%p1809_p8), [#allocation8], 4294963200  ;;  %v373_v1 = vld [vmem:[%s1781_s1 + $0x78] sm:$0xff]  ;;  %979 = vmatprep.subr.mxu0 %v389_v0  ;;  %v372_v3 = vld [vmem:[%s1781_s1 + $0x70] sm:$0xff]  ;;  %544 = vmatprep.mubr.f32.mxu1 %v1288_v52  ;;  %678 = vst [vmem:[#allocation2 + $0x5] sm:$0x7] %v1288_v52 }
  0x4f   : > { %980 = vmatpush3.msra.mxu0 %v373_v1  ;;  %v371_v5 = vld [vmem:[%s1781_s1 + $0x68] sm:$0xff]  ;;  %v386_v6 = vld [vmem:[%s1781_s1 + $0xe0] sm:$0xff]  ;;  %v385_v8 = vld [vmem:[%s1781_s1 + $0xd8] sm:$0xff]  ;;  %679 = vst [vmem:[#allocation2 + $0x18] sm:$0x7] %v1288_v52  ;;  %s1291_s22 = smov 80  }
  0x50   : > { %981 = vmatprep.subr.mxu0 %v388_v2  ;;  %v370_v7 = vld [vmem:[%s1781_s1 + $0x60] sm:$0xff]  ;;  %v369_v9 = vld [vmem:[%s1781_s1 + $0x58] sm:$0xff]  ;;  %v384_v10 = vld [vmem:[%s1781_s1 + $0xd0] sm:$0xff]  ;;  %s1292_s17 = smov 64   ;;  %s1293_s15 = smov 48  }
  0x51   : > { %982 = vmatpush3.msra.mxu0 %v372_v3  ;;  %v368_v11 = vld [vmem:[%s1781_s1 + $0x50] sm:$0xff]  ;;  %v383_v12 = vld [vmem:[%s1781_s1 + $0xc8] sm:$0xff]  ;;  %v1530_v15 = vld [vmem:[%s1474_s20 + $0x18] sm:$0xff]  ;;  %s1294_s14 = smov 32   ;;  %s734_s24 = sld [smem:[#allocation3]] }
  0x52   : > { %983 = vmatprep.subr.mxu0 %v387_v4  ;;  %v367_v13 = vld [vmem:[%s1781_s1 + $0x48] sm:$0xff]  ;;  %v1533_v16 = vld [vmem:[%s1474_s20] sm:$0xff]  ;;  %v1536_v17 = vld [vmem:[%s1474_s20 + $0x10] sm:$0xff]  ;;  %s339_s19 = scalar_lea.vmem [#allocation9], %s968_s6  ;;  %s978_s21 = sshll.u32 %s1367_s7, 9 }
  0x53   : > { %984 = vmatpush3.msra.mxu0 %v371_v5  ;;  %v1527_v14 = vld [vmem:[%s1474_s20 + $0x8] sm:$0xff]  ;;  %v382_v18 = vld [vmem:[%s1781_s1 + $0xc0] sm:$0xff]  ;;  %v344_v20 = vadd.f32 %v1536_v17, %v1533_v16  ;;  %v381_v22 = vld [vmem:[%s1781_s1 + $0xb8] sm:$0xff]  ;;  %s1290_s20 = smov 112   ;;  %s877_s25 = sshll.u32 %s339_s19, 4  ;;  %s1730_s25 = int_to_ptr.vmem [resolvable:$true] %s877_s25 }
  0x54   : > { %985 = vmatprep.subr.mxu0 %v386_v6  ;;  %v351_v19 = vadd.f32 %v1530_v15, %v1527_v14  ;;  %v366_v21 = vld [vmem:[%s1781_s1 + $0x40] sm:$0xff]  ;;  %v365_v25 = vld [vmem:[%s1781_s1 + $0x38] sm:$0xff]  ;;  %v380_v26 = vld [vmem:[%s1781_s1 + $0xb0] sm:$0xff]  ;;  %s1736_s7 = scalar_lea.hbm %s1788_s8, %s978_s21  ;;  %s864_s12 = scalar_lea.sflag [#allocation6], %s1468_s23 }
  0x55   : > { %986 = vmatpush3.msra.mxu0 %v370_v7  ;;  %v345_v24 = vrot.slane %v344_v20, 4  ;;  %v364_v29 = vld [vmem:[%s1781_s1 + $0x30] sm:$0xff]  ;;  %v379_v30 = vld [vmem:[%s1781_s1 + $0xa8] sm:$0xff]  ;;  %v378_v34 = vld [vmem:[%s1781_s1 + $0xa0] sm:$0xff]  ;;  %s1214_s28 = scalar_lea.vmem %s1730_s25, 512  ;;  %p1810_p11 = scmp.ne.s32.totalorder %s1802_s27, 0 }
  0x56   : > { %987 = vmatprep.subr.mxu0 %v385_v8  ;;  %v352_v23 = vrot.slane %v351_v19, 4  ;;  %v363_v33 = vld [vmem:[%s1781_s1 + $0x28] sm:$0xff]  ;;  %v362_v36 = vld [vmem:[%s1781_s1 + $0x20] sm:$0xff]  ;;  %v377_v38 = vld [vmem:[%s1781_s1 + $0x98] sm:$0xff]  ;;  %p1215_p3 = scmp.ne.s32.totalorder %s1730_s25, %s1214_s28 }
  0x57   : > { %988 = vmatpush3.msra.mxu0 %v369_v9  ;;  %v346_v28 = vadd.f32 %v345_v24, %v344_v20  ;;  %v361_v40 = vld [vmem:[%s1781_s1 + $0x18] sm:$0xff]  ;;  %v376_v41 = vld [vmem:[%s1781_s1 + $0x90] sm:$0xff]  ;;  %v375_v45 = vld [vmem:[%s1781_s1 + $0x88] sm:$0xff] }
  0x58   : > { %989 = vmatprep.subr.mxu0 %v384_v10  ;;  %v353_v27 = vadd.f32 %v352_v23, %v351_v19  ;;  %v360_v43 = vld [vmem:[%s1781_s1 + $0x10] sm:$0xff]  ;;  %v359_v46 = vld [vmem:[%s1781_s1 + $0x8] sm:$0xff]  ;;  %v374_v47 = vld [vmem:[%s1781_s1 + $0x80] sm:$0xff]  ;;  %p1216_p7 = pnand %p1215_p3, %p1810_p11 }
  0x59   : > { %990 = vmatpush3.msra.mxu0 %v368_v11  ;;  %v347_v32 = vrot.slane %v346_v28, 2  ;;  %v358_v48 = vld [vmem:[%s1781_s1] sm:$0xff]  ;;  %v463_v50 = vld [vmem:[%s1783_s3 + $0x8] sm:$0xff]  ;;  %v602_v53 = vld [vmem:[%s1785_s5 + $0xf8] sm:$0xff] }
  0x5a   : > { %991 = vmatprep.subr.mxu0 %v383_v12  ;;  %v354_v31 = vrot.slane %v353_v27, 2  ;;  %510 = vmatprep.subr.mxu1 %v463_v50  ;;  %v462_v51 = vld [vmem:[%s1783_s3] sm:$0xff]  ;;  %v586_v60 = vld [vmem:[%s1785_s5 + $0x78] sm:$0xff]  ;;  %v601_v61 = vld [vmem:[%s1785_s5 + $0xf0] sm:$0xff]  ;;  %p1217_p9 = pneg %p1216_p7 }
  0x5b   : > { %992 = vmatpush3.msra.mxu0 %v367_v13  ;;  %v348_v37 = vadd.f32 %v347_v32, %v346_v28  ;;  %511 = vmatpush1.msra.mxu1 %v462_v51  ;;  %v390_v55 = vld [vmem:[%s1782_s2] sm:$0x1]  ;;  %v585_v62 = vld [vmem:[%s1785_s5 + $0x70] sm:$0xff]  ;;  %v600_v63 = vld [vmem:[%s1785_s5 + $0xe8] sm:$0xff] }
  0x5c   : > { %993 = vmatprep.subr.mxu0 %v382_v18  ;;  %v355_v35 = vadd.f32 %v354_v31, %v353_v27  ;;  %1014 = vmatprep.subr.mxu1 %v602_v53  ;;  %v584_v0 = vld [vmem:[%s1785_s5 + $0x68] sm:$0xff]  ;;  %v599_v1 = vld [vmem:[%s1785_s5 + $0xe0] sm:$0xff]  ;;  %v598_v3 = vld [vmem:[%s1785_s5 + $0xd8] sm:$0xff]  ;;  %v466_v31 = vlaneseq }
  0x5d   : > { %994 = vmatpush3.msra.mxu0 %v366_v21  ;;  %v349_v44 = vrot.slane %v348_v37, 1  ;;  %v583_v2 = vld [vmem:[%s1785_s5 + $0x60] sm:$0xff]  ;;  %v582_v4 = vld [vmem:[%s1785_s5 + $0x58] sm:$0xff]  ;;  %v597_v5 = vld [vmem:[%s1785_s5 + $0xd0] sm:$0xff] }
  0x5e   : > { %995 = vmatprep.subr.mxu0 %v381_v22  ;;  %v356_v39 = vrot.slane %v355_v35, 1  ;;  %v581_v6 = vld [vmem:[%s1785_s5 + $0x50] sm:$0xff]  ;;  %v596_v7 = vld [vmem:[%s1785_s5 + $0xc8] sm:$0xff]  ;;  %v595_v9 = vld [vmem:[%s1785_s5 + $0xc0] sm:$0xff]  ;;  %v467_v32 = vshrl.u32 %v466_v31, 7 }
  0x5f   : > { %996 = vmatpush3.msra.mxu0 %v365_v25  ;;  %v350_v49 = vadd.f32 %v349_v44, %v348_v37  ;;  %v580_v8 = vld [vmem:[%s1785_s5 + $0x48] sm:$0xff]  ;;  %v579_v10 = vld [vmem:[%s1785_s5 + $0x40] sm:$0xff]  ;;  %v594_v11 = vld [vmem:[%s1785_s5 + $0xb8] sm:$0xff] }
  0x60   : > { %997 = vmatprep.subr.mxu0 %v380_v26  ;;  %v357_v42 = vadd.f32 %v356_v39, %v355_v35  ;;  %v578_v12 = vld [vmem:[%s1785_s5 + $0x38] sm:$0xff]  ;;  %v593_v13 = vld [vmem:[%s1785_s5 + $0xb0] sm:$0xff]  ;;  %v592_v19 = vld [vmem:[%s1785_s5 + $0xa8] sm:$0xff]  ;;  %v472_v35 = vsub.s32 1, %v467_v32 }
  0x61   : > { %998 = vmatpush3.msra.mxu0 %v364_v29  ;;  %v577_v18 = vld [vmem:[%s1785_s5 + $0x30] sm:$0xff]  ;;  %v576_v20 = vld [vmem:[%s1785_s5 + $0x28] sm:$0xff]  ;;  %v591_v21 = vld [vmem:[%s1785_s5 + $0xa0] sm:$0xff] }
  0x62   : > { %999 = vmatprep.subr.mxu0 %v379_v30  ;;  %455 = vmatprep.mubr.f32.mxu0 %v357_v42  ;;  %v575_v22 = vld [vmem:[%s1785_s5 + $0x20] sm:$0xff]  ;;  %v590_v23 = vld [vmem:[%s1785_s5 + $0x98] sm:$0xff]  ;;  %v589_v25 = vld [vmem:[%s1785_s5 + $0x90] sm:$0xff] }
  0x63   : > { %1000 = vmatpush3.msra.mxu0 %v363_v33  ;;  %v574_v24 = vld [vmem:[%s1785_s5 + $0x18] sm:$0xff]  ;;  %v573_v26 = vld [vmem:[%s1785_s5 + $0x10] sm:$0xff]  ;;  %v588_v27 = vld [vmem:[%s1785_s5 + $0x88] sm:$0xff]  ;;  %v468_v33 = vsub.s32 0, %v467_v32 }
  0x64   : > { %1001 = vmatprep.subr.mxu0 %v378_v34  ;;  %v572_v28 = vld [vmem:[%s1785_s5 + $0x8] sm:$0xff]  ;;  %v587_v29 = vld [vmem:[%s1785_s5 + $0x80] sm:$0xff]  ;;  %v753_v32 = vld [vmem:[#allocation7 + $0x38] sm:$0xff] }
  0x65   : > { %1002 = vmatpush3.msra.mxu0 %v362_v36  ;;  %v571_v30 = vld [vmem:[%s1785_s5] sm:$0xff] }
  0x66   : > { %1003 = vmatprep.subr.mxu0 %v377_v38  ;;  %v464_v34 = vld [vmem:[%s1784_s4] sm:$0x3] }
  0x67   : > { %1004 = vmatpush3.msra.mxu0 %v361_v40  ;;  %v469_v36 = vrot.slane %v464_v34, %v468_v33  ;;  %v473_v37 = vrot.slane %v464_v34, %v472_v35  ;;  %v754_v31 = vld [vmem:[#allocation7 + $0x40] sm:$0xff]  ;;  %v751_v34 = vld [vmem:[#allocation7 + $0x28] sm:$0xff] }
  0x68   : > { %1005 = vmatprep.subr.mxu0 %v376_v41  ;;  %v750_v35 = vld [vmem:[#allocation7 + $0x20] sm:$0xff] }
  0x69   : > { %1006 = vmatpush3.msra.mxu0 %v360_v43 }
  0x6a   : > { %1007 = vmatprep.subr.mxu0 %v375_v45 }
  0x6b   : > { %1008 = vmatpush3.msra.mxu0 %v359_v46 }
  0x6c   : > { %1009 = vmatprep.subr.mxu0 %v374_v47 }
  0x6d   : > { %1010 = vmatpush3.msra.mxu0 %v358_v48 }
  0x6e   : > { %456 = vmatmul.mubr.f32.vlgmr.msra.gmra.mxu0 %v350_v49 }
  0x6f   : > { %842 = vmatprep.mubr.f32.mxu0 %v1288_v52 }
 0x12e   : > { %v1011_v54 = vpop.f32.mrf.mxu0 }
 0x130   : > { %v1012_v56 = vpop.f32.mrf.mxu0 }
 0x131   : > { %v1013_v57 = vadd.f32 %v1012_v56, %v1011_v54 }
 0x133   : > { %v458_v58 = vadd.f32 %v1013_v57, %v390_v55 }
 0x135   : > { %v461_v59 = vmax.f32 %v458_v58, 0.0 }
 0x137   : > { %971 = vmatmul.mubr.msk.f32.vlgmr.msra.gmra.mxu1 %vm476_vm0, %v461_v59 }
 0x138   : > { %1015 = vmatpush3.msra.mxu1 %v586_v60 }
 0x139   : > { %1016 = vmatprep.subr.mxu1 %v601_v61 }
 0x13a   : > { %1017 = vmatpush3.msra.mxu1 %v585_v62  ;;  %v776_v62 = vld [vmem:[#allocation7 + $0xf0] sm:$0xff] }
 0x13b   : > { %1018 = vmatprep.subr.mxu1 %v600_v63  ;;  %v775_v63 = vld [vmem:[#allocation7 + $0xe8] sm:$0xff] }
 0x13c   : > { %1019 = vmatpush3.msra.mxu1 %v584_v0 }
 0x13d   : > { %1020 = vmatprep.subr.mxu1 %v599_v1  ;;  %v773_v1 = vld [vmem:[#allocation7 + $0xd8] sm:$0xff] }
 0x13e   : > { %1021 = vmatpush3.msra.mxu1 %v583_v2  ;;  %v772_v2 = vld [vmem:[#allocation7 + $0xd0] sm:$0xff] }
 0x13f   : > { %1022 = vmatprep.subr.mxu1 %v598_v3 }
 0x140   : > { %1023 = vmatpush3.msra.mxu1 %v582_v4  ;;  %v771_v4 = vld [vmem:[#allocation7 + $0xc8] sm:$0xff] }
 0x141   : > { %1024 = vmatprep.subr.mxu1 %v597_v5  ;;  %v770_v5 = vld [vmem:[#allocation7 + $0xc0] sm:$0xff] }
 0x142   : > { %1025 = vmatpush3.msra.mxu1 %v581_v6  ;;  %v769_v6 = vld [vmem:[#allocation7 + $0xb8] sm:$0xff] }
 0x143   : > { %1026 = vmatprep.subr.mxu1 %v596_v7 }
 0x144   : > { %1027 = vmatpush3.msra.mxu1 %v580_v8 }
 0x145   : > { %1028 = vmatprep.subr.mxu1 %v595_v9  ;;  %v768_v9 = vld [vmem:[#allocation7 + $0xb0] sm:$0xff] }
 0x146   : > { %1029 = vmatpush3.msra.mxu1 %v579_v10  ;;  %v767_v10 = vld [vmem:[#allocation7 + $0xa8] sm:$0xff] }
 0x147   : > { %1030 = vmatprep.subr.mxu1 %v594_v11  ;;  %v766_v11 = vld [vmem:[#allocation7 + $0xa0] sm:$0xff] }
 0x148   : > { %1031 = vmatpush3.msra.mxu1 %v578_v12 }
 0x149   : > { %1032 = vmatprep.subr.mxu1 %v593_v13 }
 0x14a   : > { %1033 = vmatpush3.msra.mxu1 %v577_v18  ;;  %v765_v18 = vld [vmem:[#allocation7 + $0x98] sm:$0xff] }
 0x14b   : > { %1034 = vmatprep.subr.mxu1 %v592_v19  ;;  %v764_v19 = vld [vmem:[#allocation7 + $0x90] sm:$0xff] }
 0x14c   : > { %1035 = vmatpush3.msra.mxu1 %v576_v20  ;;  %v763_v20 = vld [vmem:[#allocation7 + $0x88] sm:$0xff] }
 0x14d   : > { %1036 = vmatprep.subr.mxu1 %v591_v21 }
 0x14e   : > { %1037 = vmatpush3.msra.mxu1 %v575_v22 }
 0x14f   : > { %1038 = vmatprep.subr.mxu1 %v590_v23  ;;  %v762_v23 = vld [vmem:[#allocation7 + $0x80] sm:$0xff] }
 0x150   : > { %1039 = vmatpush3.msra.mxu1 %v574_v24  ;;  %v761_v24 = vld [vmem:[#allocation7 + $0x78] sm:$0xff] }
 0x151   : > { %1040 = vmatprep.subr.mxu1 %v589_v25  ;;  %v760_v25 = vld [vmem:[#allocation7 + $0x70] sm:$0xff] }
 0x152   : > { %1041 = vmatpush3.msra.mxu1 %v573_v26  ;;  %v759_v26 = vld [vmem:[#allocation7 + $0x68] sm:$0xff] }
 0x153   : > { %1042 = vmatprep.subr.mxu1 %v588_v27  ;;  %v758_v27 = vld [vmem:[#allocation7 + $0x60] sm:$0xff] }
 0x154   : > { %1043 = vmatpush3.msra.mxu1 %v572_v28  ;;  %v757_v28 = vld [vmem:[#allocation7 + $0x58] sm:$0xff] }
 0x155   : > { %1044 = vmatprep.subr.mxu1 %v587_v29  ;;  %v756_v29 = vld [vmem:[#allocation7 + $0x50] sm:$0xff] }
 0x156   : > { %1045 = vmatpush3.msra.mxu1 %v571_v30  ;;  %v755_v30 = vld [vmem:[#allocation7 + $0x48] sm:$0xff] }
 0x1f7   : > { %v546_v38 = vpop.f32.mrf.mxu1 }
 0x1f8   : > { %v547_v39 = vadd.f32 %v546_v38, %v469_v36  ;;  %v749_v36 = vld [vmem:[#allocation7 + $0x18] sm:$0xff]  ;;  %v747_v38 = vld [vmem:[#allocation7 + $0x8] sm:$0xff] }
 0x1f9   : > { %v548_v40 = vpop.f32.mrf.mxu1 }
 0x1fa   : > { %v551_v41 = vmul.f32 0.5, %v547_v39  ;;  %v549_v42 = vadd.f32 %v548_v40, %v473_v37  ;;  %v748_v37 = vld [vmem:[#allocation7 + $0x10] sm:$0xff]  ;;  %v746_v39 = vld [vmem:[#allocation7] sm:$0xff] }
 0x1fc   : > { %1152 = vtanh.f32 %v551_v41  ;;  %v552_v43 = vmul.f32 0.5, %v549_v42 }
 0x1fe   : > { %1154 = vtanh.f32 %v552_v43 }
 0x209   : > { %v1153_v44 = vpop.eup %1152 }
 0x20a   : > { %v555_v45 = vmul.f32 0.5, %v1153_v44 }
 0x20b   : > { %v1155_v46 = vpop.eup %1154 }
 0x20c   : > { %v557_v47 = vadd.f32 0.5, %v555_v45  ;;  %v556_v48 = vmul.f32 0.5, %v1155_v46 }
 0x20e   : > { %v558_v49 = vadd.f32 0.5, %v556_v48  ;;  %v562_v50 = vrot.slane %v557_v47, %v468_v33 }
 0x210   : > { %v566_v51 = vrot.slane %v558_v49, %v468_v33  ;;  %v1712_v54 = vmul.f32 %v562_v50, %v1533_v16  ;;  %v1721_v56 = vmul.f32 %v562_v50, %v1536_v17  ;;  %v777_v17 = vld [vmem:[#allocation7 + $0xf8] sm:$0xff]  ;;  %v752_v33 = vld [vmem:[#allocation7 + $0x30] sm:$0xff] }
 0x211   : > { %778 = vmatprep.subr.mxu0 %v777_v17  ;;  %1052 = vmatprep.subr.mxu1 %v777_v17 }
 0x212   : > { %v1709_v53 = vmul.f32 %v566_v51, %v1527_v14  ;;  %v1716_v55 = vmul.f32 %v566_v51, %v1530_v15  ;;  %779 = vmatpush1.msra.mxu0 %v776_v62 }
 0x213   : > { %780 = vmatprep.subr.mxu0 %v775_v63 }
 0x214   : > { %667 = vmatprep.mubr.f32.mxu1 %v1709_v53 }
 0x215   : > { %668 = vmatmul.mubr.f32.vlgmr.msra.gmra.mxu1 %v1712_v54 }
 0x216   : > { %672 = vmatprep.mubr.f32.mxu1 %v1716_v55  ;;  %1068 = vmatpush1.msra.mxu1 %v776_v62 }
 0x217   : > { %1053 = vmatprep.subr.mxu1 %v775_v63  ;;  %v735_v63 = vstv %s734_s24 }
 0x219   : > { %673 = vmatmul.mubr.f32.gmra.mxu1 %v1721_v56 }
 0x21a   : > { %848 = vmatprep.mubr.f32.mxu1 %v1288_v52  ;;  %v774_v52 = vld [vmem:[#allocation7 + $0xe0] sm:$0xff] }
 0x21b   : > { %781 = vmatpush1.msra.mxu0 %v774_v52  ;;  %1069 = vmatpush1.msra.mxu1 %v774_v52 }
 0x21c   : > { %782 = vmatprep.subr.mxu0 %v773_v1  ;;  %1054 = vmatprep.subr.mxu1 %v773_v1 }
 0x21d   : > { %783 = vmatpush1.msra.mxu0 %v772_v2  ;;  %1070 = vmatpush1.msra.mxu1 %v772_v2 }
 0x21e   : > { %784 = vmatprep.subr.mxu0 %v771_v4  ;;  %1055 = vmatprep.subr.mxu1 %v771_v4 }
 0x21f   : > { %785 = vmatpush1.msra.mxu0 %v770_v5  ;;  %1071 = vmatpush1.msra.mxu1 %v770_v5 }
 0x220   : > { %786 = vmatprep.subr.mxu0 %v769_v6  ;;  %1056 = vmatprep.subr.mxu1 %v769_v6 }
 0x221   : > { %787 = vmatpush1.msra.mxu0 %v768_v9  ;;  %1072 = vmatpush1.msra.mxu1 %v768_v9 }
 0x222   : > { %788 = vmatprep.subr.mxu0 %v767_v10  ;;  %1057 = vmatprep.subr.mxu1 %v767_v10 }
 0x223   : > { %789 = vmatpush1.msra.mxu0 %v766_v11  ;;  %1073 = vmatpush1.msra.mxu1 %v766_v11 }
 0x224   : > { %790 = vmatprep.subr.mxu0 %v765_v18  ;;  %1058 = vmatprep.subr.mxu1 %v765_v18 }
 0x225   : > { %791 = vmatpush1.msra.mxu0 %v764_v19  ;;  %1074 = vmatpush1.msra.mxu1 %v764_v19 }
 0x226   : > { %792 = vmatprep.subr.mxu0 %v763_v20  ;;  %1059 = vmatprep.subr.mxu1 %v763_v20 }
 0x227   : > { %793 = vmatpush1.msra.mxu0 %v762_v23  ;;  %1075 = vmatpush1.msra.mxu1 %v762_v23 }
 0x228   : > { %794 = vmatprep.subr.mxu0 %v761_v24  ;;  %1060 = vmatprep.subr.mxu1 %v761_v24 }
 0x229   : > { %795 = vmatpush1.msra.mxu0 %v760_v25  ;;  %1076 = vmatpush1.msra.mxu1 %v760_v25 }
 0x22a   : > { %796 = vmatprep.subr.mxu0 %v759_v26  ;;  %1061 = vmatprep.subr.mxu1 %v759_v26 }
 0x22b   : > { %797 = vmatpush1.msra.mxu0 %v758_v27  ;;  %1077 = vmatpush1.msra.mxu1 %v758_v27 }
 0x22c   : > { %798 = vmatprep.subr.mxu0 %v757_v28  ;;  %1062 = vmatprep.subr.mxu1 %v757_v28 }
 0x22d   : > { %799 = vmatpush1.msra.mxu0 %v756_v29  ;;  %1078 = vmatpush1.msra.mxu1 %v756_v29 }
 0x22e   : > { %800 = vmatprep.subr.mxu0 %v755_v30  ;;  %1063 = vmatprep.subr.mxu1 %v755_v30 }
 0x22f   : > { %801 = vmatpush1.msra.mxu0 %v754_v31  ;;  %1079 = vmatpush1.msra.mxu1 %v754_v31 }
 0x230   : > { %802 = vmatprep.subr.mxu0 %v753_v32  ;;  %1064 = vmatprep.subr.mxu1 %v753_v32 }
 0x231   : > { %803 = vmatpush1.msra.mxu0 %v752_v33  ;;  %1080 = vmatpush1.msra.mxu1 %v752_v33 }
 0x232   : > { %804 = vmatprep.subr.mxu0 %v751_v34  ;;  %1065 = vmatprep.subr.mxu1 %v751_v34 }
 0x233   : > { %805 = vmatpush1.msra.mxu0 %v750_v35  ;;  %1081 = vmatpush1.msra.mxu1 %v750_v35 }
 0x234   : > { %806 = vmatprep.subr.mxu0 %v749_v36  ;;  %1066 = vmatprep.subr.mxu1 %v749_v36 }
 0x235   : > { %807 = vmatpush1.msra.mxu0 %v748_v37  ;;  %1082 = vmatpush1.msra.mxu1 %v748_v37 }
 0x236   : > { %808 = vmatprep.subr.mxu0 %v747_v38  ;;  %1067 = vmatprep.subr.mxu1 %v747_v38 }
 0x237   : > { %809 = vmatpush1.msra.mxu0 %v746_v39  ;;  %1083 = vmatpush1.msra.mxu1 %v746_v39 }
 0x2d5   : > { %v1046_v14 = vpop.f32.mrf.mxu1 }
 0x2d7   : > { %v1047_v57 = vpop.f32.mrf.mxu1 }
 0x2d8   : > { %v1048_v16 = vadd.f32 %v1047_v57, %v1046_v14 }
 0x2d9   : > { %v1049_v58 = vpop.f32.mrf.mxu1 }
 0x2da   : > { %680 = vst [vmem:[#allocation2 + $0x8] sm:$0xff] %v1048_v16 }
 0x2db   : > { %v1050_v59 = vpop.f32.mrf.mxu1 }
 0x2dc   : > { %v1051_v60 = vadd.f32 %v1050_v59, %v1049_v58 }
 0x2de   : > { %681 = vst [vmem:[#allocation2 + $0x10] sm:$0xff] %v1051_v60 }
 0x2e1   : > { %v694_v15 = vld [vmem:[#allocation2 + $0x7] sm:$0xff] }
 0x2e2   : > { %v686_v61 = vld [vmem:[#allocation2 + $0x6] sm:$0xff]  ;;  %696 = vrot.lane.b32.xlu1 %v694_v15, %s1289_s11 }
 0x2e3   : > { %688 = vrot.lane.b32.xlu0 %v686_v61, %s1290_s20  ;;  %v682_v44 = vld [vmem:[#allocation2 + $0x5] sm:$0xff] }
 0x2e5   : > { %v695_v0 = vld [vmem:[#allocation2 + $0xf] sm:$0xff] }
 0x2e6   : > { %698 = vrot.lane.b32.xlu1 %v695_v0, %s1289_s11  ;;  %v687_v3 = vld [vmem:[#allocation2 + $0xe] sm:$0xff]  ;;  %s1295_s11 = smov [#allocation9]  }
 0x2e7   : > { %704 = vrot.lane.b32.xlu0 %v1048_v16, %s1291_s22  ;;  %v711_v7 = vld [vmem:[#allocation2 + $0x11] sm:$0xff]  ;;  %v710_v8 = vld [vmem:[#allocation2 + $0x9] sm:$0xff] }
 0x2e8   : > { %v719_v12 = vld [vmem:[#allocation2 + $0x12] sm:$0xff]  ;;  %v718_v13 = vld [vmem:[#allocation2 + $0xa] sm:$0xff] }
 0x2e9   : > { %v727_v21 = vld [vmem:[#allocation2 + $0x13] sm:$0xff]  ;;  %v726_v22 = vld [vmem:[#allocation2 + $0xb] sm:$0xff] }
 0x2ea   : > { %706 = vrot.lane.b32.xlu1 %v1051_v60, %s1291_s22  ;;  %v683_v48 = vld [vmem:[#allocation2 + $0xd] sm:$0xff] }
 0x2eb   : > { %690 = vrot.lane.b32.xlu0 %v687_v3, %s1290_s20  ;;  %s1218_s20 = sshll.u32 %s1295_s11, 4  ;;  %s1219_s20 = int_to_ptr.vmem [resolvable:$false] %s1218_s20 }
 0x2ec   : > { %s1220_s22 = scalar_lea.vmem %s1219_s20, 1024  ;;  %p1221_p10 = scmp.lt.s32.totalorder %s1730_s25, %s1219_s20 }
 0x2ed   : > { %p1222_p12 = scmp.lt.s32.totalorder %s1220_s22, %s1214_s28 }
 0x2ee   : > { %714 = vrot.lane.b32.xlu1 %v711_v7, %s1292_s17 }
 0x2ef   : > { %712 = vrot.lane.b32.xlu0 %v710_v8, %s1292_s17  ;;  %p1223_p13 = por %p1222_p12, %p1221_p10 }
 0x2f1   : > { %p1224_p0 = pnand %p1223_p13, %p1217_p9 }
 0x2f2   : > { %722 = vrot.lane.b32.xlu1 %v719_v12, %s1293_s15 }
 0x2f3   : > { %720 = vrot.lane.b32.xlu0 %v718_v13, %s1293_s15 }
 0x2f6   : > { %730 = vrot.lane.b32.xlu1 %v727_v21, %s1294_s14 }
 0x2f7   : > { %728 = vrot.lane.b32.xlu0 %v726_v22, %s1294_s14 }
 0x354   : > { %v697_v40 = vpop.permute.xlu1 %696 }
 0x355   : > { %v689_v41 = vpop.permute.xlu0 %688 }
 0x356   : > { %v692_v45 = vadd.f32 %v689_v41, %v682_v44 }
 0x358   : > { %v699_v42 = vpop.permute.xlu1 %698  ;;  %v700_v50 = vadd.f32 %v697_v40, %v692_v45 }
 0x359   : > { %v705_v43 = vpop.permute.xlu0 %704 }
 0x35a   : > { %v708_v58 = vadd.f32 %v705_v43, %v700_v50 }
 0x35c   : > { %v707_v46 = vpop.permute.xlu1 %706 }
 0x35d   : > { %v691_v47 = vpop.permute.xlu0 %690 }
 0x35e   : > { %v693_v49 = vadd.f32 %v691_v47, %v683_v48 }
 0x360   : > { %v701_v51 = vadd.f32 %v699_v42, %v693_v49  ;;  %v715_v14 = vpop.permute.xlu1 %714 }
 0x361   : > { %v713_v57 = vpop.permute.xlu0 %712 }
 0x362   : > { %v709_v16 = vadd.f32 %v707_v46, %v701_v51  ;;  %v716_v61 = vadd.f32 %v713_v57, %v708_v58 }
 0x364   : > { %v717_v59 = vadd.f32 %v715_v14, %v709_v16  ;;  %v723_v60 = vpop.permute.xlu1 %722 }
 0x365   : > { %v721_v15 = vpop.permute.xlu0 %720 }
 0x366   : > { %v725_v17 = vadd.f32 %v723_v60, %v717_v59  ;;  %v724_v62 = vadd.f32 %v721_v15, %v716_v61 }
 0x368   : > { %v731_v52 = vpop.permute.xlu1 %730 }
 0x369   : > { %v729_v0 = vpop.permute.xlu0 %728  ;;  %v733_v1 = vadd.f32 %v731_v52, %v725_v17 }
 0x36a   : > { %v732_v2 = vadd.f32 %v729_v0, %v724_v62 }
 0x36b   : > { %v737_v3 = vadd.f32 %v735_v63, %v733_v1 }
 0x36c   : > { %v736_v4 = vadd.f32 %v735_v63, %v732_v2 }
 0x36d   : > { %v739_v5 = vmul.f32 0.5, %v737_v3 }
 0x36e   : > { %v738_v6 = vmul.f32 0.5, %v736_v4 }
 0x36f   : > { %1156 = vtanh.f32 %v739_v5 }
 0x370   : > { %1158 = vtanh.f32 %v738_v6 }
 0x37c   : > { %v1157_v7 = vpop.eup %1156 }
 0x37d   : > { %v1159_v8 = vpop.eup %1158  ;;  %v743_v9 = vmul.f32 0.5, %v1157_v7 }
 0x37e   : > { %v742_v10 = vmul.f32 0.5, %v1159_v8 }
 0x37f   : > { %v745_v11 = vadd.f32 0.5, %v743_v9 }
 0x380   : > { %v744_v12 = vadd.f32 0.5, %v742_v10 }
 0x381   : > { %849 = vmatmul.mubr.f32.vlgmr.msra.gmra.mxu1 %v745_v11 }
 0x382   : > { %843 = vmatmul.mubr.f32.vlgmr.msra.gmra.mxu0 %v744_v12 }
 0x441   : > { %v850_v13 = vpop.f32.mrf.mxu1 }
 0x442   : > { %v844_v18 = vpop.f32.mrf.mxu0  ;;  %v857_v19 = vmul.f32 %v850_v13, %v1721_v56 }
 0x443   : > { %v855_v20 = vmul.f32 %v844_v18, %v1712_v54  ;;  %v852_v21 = vpop.f32.mrf.mxu1 }
 0x444   : > { %861 = vst [vmem:[%s339_s19 + $0x10] sm:$0xff] %v857_v19  ;;  %v846_v22 = vpop.f32.mrf.mxu0  ;;  %v858_v23 = vmul.f32 %v852_v21, %v1716_v55 }
 0x445   : > { %859 = vst [vmem:[%s339_s19] sm:$0xff] %v855_v20  ;;  %v856_v56 = vmul.f32 %v846_v22, %v1709_v53 }
 0x446   : > { %862 = vst [vmem:[%s339_s19 + $0x18] sm:$0xff] %v858_v23 }
 0x447   : > { %860 = vst [vmem:[%s339_s19 + $0x8] sm:$0xff] %v856_v56 }
 0x448   : > { %1227 = shalt.err (!%p1224_p0)
}
 0x449   : > { %s1228_s17 = scalar_lea.hbm %s1736_s7, 512  ;;  %s1232_s24 = scalar_lea.hbm %s1788_s8, 1024 }
 0x44a   : > { %p1229_p5 = scmp.ne.s32.totalorder %s1736_s7, %s1228_s17  ;;  %p1233_p4 = scmp.lt.s32.totalorder %s1736_s7, %s1788_s8 }
 0x44b   : > { %p1234_p6 = scmp.lt.s32.totalorder %s1232_s24, %s1228_s17 }
 0x44c   : > { %p1230_p2 = pnand %p1229_p5, %p1810_p11 }
 0x44d   : > { %p1235_p8 = por %p1234_p6, %p1233_p4 }
 0x44e   : > { %p1231_p1 = pneg %p1230_p2 }
 0x450   : > { %p1236_p3 = pnand %p1235_p8, %p1231_p1 }
 0x452   : > { %1239 = shalt.err (!%p1236_p3)
}
 0x453   : > { %s1296_s6 = smov 256   ;;  %s1297_s16 = smov 16  }
 0x454   : > { %1090 = dma.vmem_to_hbm [thread:$0]  (%p1810_p11), %s1730_s25, 512, %s1736_s7, %s864_s12, %s1296_s6, %s1296_s6, %s1297_s16  }
 0x455 PF: > { %s892_s28 = sand.u32 1, %s1270_s29   ;;  %p1811_p7 = scmp.ne.s32.totalorder %s1797_s13, 0 }
 0x456   : > { %p1812_p9 = scmp.ge.s32.totalorder %s1282_s10, 2  ;;  %s893_s11 = scalar_lea.sflag [#allocation6], %s892_s28 }
 0x458   : > { %p1101_p10 = pnand %p1812_p9, %p1811_p7 }
 0x45a   : > { %p1102_p12 = pneg %p1101_p10 }
 0x45c   : > { %1265 = dma.done.wait (%p1102_p12), %s893_s11, 512  }
 0x45d   : > { %1267 = vsyncadd (%p1102_p12), %s893_s11, 4294966784  ;;  %p23_p13 = scmp.ge.s32.totalorder %s1400_s18, 4   ;;  %s1813_s29 = smov %s1274_s30 }
 0x45e   : > { %s1814_s30 = smov %s1278_s9  ;;  %s1815_s9 = smov %s1420_s26 }
 0x45f   : > { %s1816_s10 = smov %s1400_s18  ;;  %25 = sbr.rel (!%p23_p13) target bundleno = 9 (0x9), region = 101 }
 0x464   :  { %898 = vsyncpa [#allocation5], 1 }
 0x465   :  { %900 = vsyncpa [#allocation5 + $0x1], 1 }
 0x466   :  { %901 = vsyncpa [#allocation8], 1 }
 0x467   :  { %902 = vsyncpa [#allocation6], 1 }
 0x468   :  { %904 = vsyncpa [#allocation6 + $0x1], 1 }

</bundles_post_ra>
